<compile_context>
chip_gen: v7x
topology: tpu7x:2x2x1
jax: 0.10.0
libtpu: 0.0.40
codegen_flags: <defaults>
</compile_context>

<pallas_src>
import jax
import jax.numpy as jnp
from jax.experimental import pallas as pl
from jax.experimental.pallas import tpu as pltpu


def _round_up(x, m):
    return ((x + m - 1) // m) * m


# ---------------------------------------------------------------------------
# Kernel: one batch tile of the full 4-layer MLP.
# ---------------------------------------------------------------------------
def _mlp_kernel(x_ref, w1_ref, w23_ref, w4_ref, b_ref, o_ref):
    out_w = o_ref.shape[1]
    b = b_ref[...]                                   # (4, HP) f32, resident

    # Cast the streamed f32 activations to bf16 here (VPU, essentially free),
    # so the wrapper never pays a dedicated cast pass over the whole input.
    x = x_ref[...].astype(w1_ref.dtype)

    # fc1 + ReLU  (bf16 operands on the MXU, f32 accumulation)
    h = jnp.dot(x, w1_ref[...], preferred_element_type=jnp.float32) + b[0:1, :]
    h = jnp.maximum(h, 0.0)
    # fc2 + ReLU
    h = jnp.dot(h.astype(w23_ref.dtype), w23_ref[0],
                preferred_element_type=jnp.float32) + b[1:2, :]
    h = jnp.maximum(h, 0.0)
    # fc3 + ReLU
    h = jnp.dot(h.astype(w23_ref.dtype), w23_ref[1],
                preferred_element_type=jnp.float32) + b[2:3, :]
    h = jnp.maximum(h, 0.0)
    # fc4 + Tanh (output kept 2-wide; do not pad the writeback)
    h = jnp.dot(h.astype(w4_ref.dtype), w4_ref[...],
                preferred_element_type=jnp.float32) + b[3:4, 0:out_w]
    o_ref[...] = jnp.tanh(h).astype(o_ref.dtype)


# ---------------------------------------------------------------------------
# Batch-tile selection
# ---------------------------------------------------------------------------
def _pick_tb(B):
    """Pick the batch tile TB.

    - As large as possible (amortize ~0.35 us/step overhead and the fill/drain
      of the 4 back-to-back dependent matmuls), capped at 2048 rows so the
      double-buffered f32 x tile (~6 MiB) fits v5e's 16 MiB default scoped VMEM.
    - Mid-size batches are split into (at least) 2 grid steps so a 2-TC chip
      (v7x) can shard the 'parallel' grid axis; each TC holding its own ~165 KB
      copy of the resident weights is fine.
    """
    TB_MAX = 2048
    B8 = _round_up(max(B, 1), 8)
    if B8 <= 16:
        return B8                                  # tiny batch: a single step
    if B8 <= 2 * TB_MAX:
        return _round_up(pl.cdiv(B8, 2), 8)        # ~2 steps -> both TCs busy
    return TB_MAX


# ---------------------------------------------------------------------------
# Wrapper
# ---------------------------------------------------------------------------
@jax.jit
def fully_connected_net(x_nchw, packed):
    """Forward pass of FullyConnectedNet.

    x_nchw: [B, 2, 14, 14] float32 (NCHW; flattened row-major to [B, 392],
            same semantics as torch .view(-1, 392)).
    packed: output of pack_params() (padded bf16 weights + packed f32 biases).
    Returns: [B, 2] float32.
    """
    w1, w23, w4, bpack = packed["w1"], packed["w23"], packed["w4"], packed["b"]
    B = x_nchw.shape[0]
    IN = w1.shape[0]          # 392
    HP = w1.shape[1]          # hidden padded to a multiple of 128
    OUT = w4.shape[1]         # 2

    # No astype and no pad in the wrapper: stream f32 directly; a ragged cdiv
    # grid handles B % TB != 0 (out-of-range rows are masked on writeback).
    x = x_nchw.reshape(B, IN)

    TB = _pick_tb(B)
    grid = (pl.cdiv(B, TB),)

    weight_bytes = (w1.size * w1.dtype.itemsize
                    + w23.size * w23.dtype.itemsize
                    + w4.size * w4.dtype.itemsize
                    + bpack.size * bpack.dtype.itemsize)
    flops = 2 * B * (IN * HP + 2 * HP * HP + HP * OUT)
    bytes_accessed = B * IN * 4 + weight_bytes + B * OUT * 4

    out = pl.pallas_call(
        _mlp_kernel,
        out_shape=jax.ShapeDtypeStruct((B, OUT), jnp.float32),
        grid=grid,
        in_specs=[
            pl.BlockSpec((TB, IN), lambda i: (i, 0)),        # x: batch-tiled f32
            pl.BlockSpec((IN, HP), lambda i: (0, 0)),        # w1: resident
            pl.BlockSpec((2, HP, HP), lambda i: (0, 0, 0)),  # w2/w3: resident
            pl.BlockSpec((HP, OUT), lambda i: (0, 0)),       # w4: resident
            pl.BlockSpec((4, HP), lambda i: (0, 0)),         # packed biases
        ],
        out_specs=pl.BlockSpec((TB, OUT), lambda i: (i, 0)),
        compiler_params=pltpu.CompilerParams(
            dimension_semantics=("parallel",)),
        cost_estimate=pl.CostEstimate(
            flops=flops,
            transcendentals=B * OUT,
            bytes_accessed=bytes_accessed),
    )(x, w1, w23, w4, bpack)
    return out


# ---------------------------------------------------------------------------
# Parameter init (matches torch.nn.Linear's U(-1/sqrt(fan_in), +...)) + packing
# ---------------------------------------------------------------------------
def _init_linear(key, fan_in, fan_out):
    kw, kb = jax.random.split(key)
    bound = 1.0 / jnp.sqrt(jnp.float32(fan_in))
    # stored (in, out), i.e. transpose of torch's (out, in) weight
    w = jax.random.uniform(kw, (fan_in, fan_out), jnp.float32, -bound, bound)
    b = jax.random.uniform(kb, (1, fan_out), jnp.float32, -bound, bound)
    return w, b


def init_params(key, nb_hidden=32):
    k1, k2, k3, k4 = jax.random.split(key, 4)
    w1, b1 = _init_linear(k1, 392, nb_hidden)
    w2, b2 = _init_linear(k2, nb_hidden, nb_hidden)
    w3, b3 = _init_linear(k3, nb_hidden, nb_hidden)
    w4, b4 = _init_linear(k4, nb_hidden, 2)
    return dict(w1=w1, b1=b1, w2=w2, b2=b2, w3=w3, b3=b3, w4=w4, b4=b4)


def pack_params(params, compute_dtype=jnp.bfloat16):
    """Zero-pad hidden width to a multiple of 128 (lane-dense), cast weights to
    bf16, stack w2/w3, and pack all biases into one (4, HP) f32 array."""
    w1, b1 = params["w1"], params["b1"]
    w2, b2 = params["w2"], params["b2"]
    w3, b3 = params["w3"], params["b3"]
    w4, b4 = params["w4"], params["b4"]
    _, H = w1.shape
    OUT = w4.shape[1]
    HP = _round_up(max(H, 128), 128)
    pad = HP - H

    w1p = jnp.pad(w1, ((0, 0), (0, pad))).astype(compute_dtype)
    w2p = jnp.pad(w2, ((0, pad), (0, pad))).astype(compute_dtype)
    w3p = jnp.pad(w3, ((0, pad), (0, pad))).astype(compute_dtype)
    w4p = jnp.pad(w4, ((0, pad), (0, 0))).astype(compute_dtype)
    w23p = jnp.stack([w2p, w3p], axis=0)

    bpack = jnp.zeros((4, HP), jnp.float32)
    bpack = bpack.at[0, :H].set(b1.reshape(-1))
    bpack = bpack.at[1, :H].set(b2.reshape(-1))
    bpack = bpack.at[2, :H].set(b3.reshape(-1))
    bpack = bpack.at[3, :OUT].set(b4.reshape(-1))
    return dict(w1=w1p, w23=w23p, w4=w4p, b=bpack)


# ---------------------------------------------------------------------------
# References
# ---------------------------------------------------------------------------
def _reference_f32(x_nchw, p):
    x = x_nchw.reshape(x_nchw.shape[0], 392)
    h = jnp.maximum(x @ p["w1"] + p["b1"], 0.0)
    h = jnp.maximum(h @ p["w2"] + p["b2"], 0.0)
    h = jnp.maximum(h @ p["w3"] + p["b3"], 0.0)
    return jnp.tanh(h @ p["w4"] + p["b4"])


def _reference_bf16(x_nchw, p):
    """Same math with bf16 operands + f32 accumulation (matches kernel dtypes)."""
    bf = jnp.bfloat16

    def lin(h, w, b):
        return jnp.dot(h.astype(bf), w.astype(bf),
                       preferred_element_type=jnp.float32) + b.astype(jnp.float32)

    x = x_nchw.reshape(x_nchw.shape[0], 392)
    h = jnp.maximum(lin(x, p["w1"], p["b1"]), 0.0)
    h = jnp.maximum(lin(h, p["w2"], p["b2"]), 0.0)
    h = jnp.maximum(lin(h, p["w3"], p["b3"]), 0.0)
    return jnp.tanh(lin(h, p["w4"], p["b4"]))


if __name__ == "__main__":
    key = jax.random.PRNGKey(0)
    kx, kp, kx2 = jax.random.split(key, 3)

    nb_hidden = 32
    params = init_params(kp, nb_hidden=nb_hidden)
    packed = pack_params(params)

    # --- small, tile-aligned batch ---------------------------------------
    batch = 8
    x = jax.random.normal(kx, (batch, 2, 14, 14), jnp.float32)  # 2*14*14 = 392
    out = jax.block_until_ready(fully_connected_net(x, packed))
    assert out.shape == (batch, 2), out.shape

    ref_bf16 = _reference_bf16(x, params)   # same dtype recipe as the kernel
    ref_f32 = _reference_f32(x, params)     # original f32 module semantics
    assert jnp.allclose(out, ref_bf16, atol=1e-4, rtol=1e-4), "mismatch vs bf16 reference"
    assert jnp.allclose(out, ref_f32, atol=5e-2), "mismatch vs f32 module reference"

    # --- ragged batch (exercises the cdiv grid / masked last block) -------
    batch2 = 20
    x2 = jax.random.normal(kx2, (batch2, 2, 14, 14), jnp.float32)
    out2 = jax.block_until_ready(fully_connected_net(x2, packed))
    assert out2.shape == (batch2, 2), out2.shape
    assert jnp.allclose(out2, _reference_bf16(x2, params), atol=1e-4, rtol=1e-4), \
        "mismatch vs bf16 reference (ragged batch)"
    assert jnp.allclose(out2, _reference_f32(x2, params), atol=5e-2), \
        "mismatch vs f32 module reference (ragged batch)"

    print("KERNEL_OK")
</pallas_src>

<mosaic_0001>
module attributes {stable_mosaic.version = 11 : i64} {
  func.func @_mlp_kernel(%arg0: i32, %arg1: memref<8x392xf32, #tpu.memory_space<vmem>>, %arg2: memref<392x128xbf16, #tpu.memory_space<vmem>>, %arg3: memref<2x128x128xbf16, #tpu.memory_space<vmem>>, %arg4: memref<128x2xbf16, #tpu.memory_space<vmem>>, %arg5: memref<4x128xf32, #tpu.memory_space<vmem>>, %arg6: memref<8x2xf32, #tpu.memory_space<vmem>>) attributes {dimension_semantics = [#tpu.dimension_semantics<parallel>], iteration_bounds = array<i64: 1>, scalar_prefetch = 0 : i64, scratch_operands = 0 : i64, tpu.core_type = #tpu.core_type<tc>, window_params = [{transform_indices = @transform_0, window_bounds = array<i64: 8, 392>}, {pipeline_mode = #tpu.pipeline_mode<synchronous>, transform_indices = @transform_1, window_bounds = array<i64: 392, 128>}, {pipeline_mode = #tpu.pipeline_mode<synchronous>, transform_indices = @transform_2, window_bounds = array<i64: 2, 128, 128>}, {pipeline_mode = #tpu.pipeline_mode<synchronous>, transform_indices = @transform_3, window_bounds = array<i64: 128, 2>}, {pipeline_mode = #tpu.pipeline_mode<synchronous>, transform_indices = @transform_4, window_bounds = array<i64: 4, 128>}, {transform_indices = @transform_5, window_bounds = array<i64: 8, 2>}]} {
    %c0 = arith.constant 0 : index
    %c0_0 = arith.constant 0 : index
    %0 = vector.load %arg5[%c0, %c0_0] : memref<4x128xf32, #tpu.memory_space<vmem>>, vector<4x128xf32>
    %c0_1 = arith.constant 0 : index
    %c0_2 = arith.constant 0 : index
    %1 = vector.load %arg1[%c0_1, %c0_2] : memref<8x392xf32, #tpu.memory_space<vmem>>, vector<8x392xf32>
    %2 = arith.truncf %1 : vector<8x392xf32> to vector<8x392xbf16>
    %c0_3 = arith.constant 0 : index
    %c0_4 = arith.constant 0 : index
    %3 = vector.load %arg2[%c0_3, %c0_4] : memref<392x128xbf16, #tpu.memory_space<vmem>>, vector<392x128xbf16>
    %cst = arith.constant dense<0.000000e+00> : vector<8x128xf32>
    %4 = tpu.matmul %2, %3, %cst {dimension_numbers = #tpu.dot_dimension_numbers<[1], [0], [0], [1], [0, 0, 1, 1], [], []>} : vector<8x392xbf16>, vector<392x128xbf16>, vector<8x128xf32> -> vector<8x128xf32>
    %5 = vector.extract_strided_slice %0 {offsets = [0, 0], sizes = [1, 128], strides = [1, 1]} : vector<4x128xf32> to vector<1x128xf32>
    %6 = vector.broadcast %5 : vector<1x128xf32> to vector<8x128xf32>
    %7 = arith.addf %4, %6 : vector<8x128xf32>
    %cst_5 = arith.constant 0.000000e+00 : f32
    %8 = vector.broadcast %cst_5 : f32 to vector<8x128xf32>
    %9 = arith.maximumf %7, %8 : vector<8x128xf32>
    %10 = arith.truncf %9 : vector<8x128xf32> to vector<8x128xbf16>
    %c0_6 = arith.constant 0 : index
    %c0_7 = arith.constant 0 : index
    %c0_8 = arith.constant 0 : index
    %11 = vector.load %arg3[%c0_6, %c0_7, %c0_8] : memref<2x128x128xbf16, #tpu.memory_space<vmem>>, vector<1x128x128xbf16>
    %12 = vector.shape_cast %11 : vector<1x128x128xbf16> to vector<128x128xbf16>
    %cst_9 = arith.constant dense<0.000000e+00> : vector<8x128xf32>
    %13 = tpu.matmul %10, %12, %cst_9 {dimension_numbers = #tpu.dot_dimension_numbers<[1], [0], [0], [1], [0, 0, 1, 1], [], []>} : vector<8x128xbf16>, vector<128x128xbf16>, vector<8x128xf32> -> vector<8x128xf32>
    %14 = vector.extract_strided_slice %0 {offsets = [1, 0], sizes = [1, 128], strides = [1, 1]} : vector<4x128xf32> to vector<1x128xf32>
    %15 = vector.broadcast %14 : vector<1x128xf32> to vector<8x128xf32>
    %16 = arith.addf %13, %15 : vector<8x128xf32>
    %cst_10 = arith.constant 0.000000e+00 : f32
    %17 = vector.broadcast %cst_10 : f32 to vector<8x128xf32>
    %18 = arith.maximumf %16, %17 : vector<8x128xf32>
    %19 = arith.truncf %18 : vector<8x128xf32> to vector<8x128xbf16>
    %c1 = arith.constant 1 : index
    %c0_11 = arith.constant 0 : index
    %c0_12 = arith.constant 0 : index
    %20 = vector.load %arg3[%c1, %c0_11, %c0_12] : memref<2x128x128xbf16, #tpu.memory_space<vmem>>, vector<1x128x128xbf16>
    %21 = vector.shape_cast %20 : vector<1x128x128xbf16> to vector<128x128xbf16>
    %cst_13 = arith.constant dense<0.000000e+00> : vector<8x128xf32>
    %22 = tpu.matmul %19, %21, %cst_13 {dimension_numbers = #tpu.dot_dimension_numbers<[1], [0], [0], [1], [0, 0, 1, 1], [], []>} : vector<8x128xbf16>, vector<128x128xbf16>, vector<8x128xf32> -> vector<8x128xf32>
    %23 = vector.extract_strided_slice %0 {offsets = [2, 0], sizes = [1, 128], strides = [1, 1]} : vector<4x128xf32> to vector<1x128xf32>
    %24 = vector.broadcast %23 : vector<1x128xf32> to vector<8x128xf32>
    %25 = arith.addf %22, %24 : vector<8x128xf32>
    %cst_14 = arith.constant 0.000000e+00 : f32
    %26 = vector.broadcast %cst_14 : f32 to vector<8x128xf32>
    %27 = arith.maximumf %25, %26 : vector<8x128xf32>
    %28 = arith.truncf %27 : vector<8x128xf32> to vector<8x128xbf16>
    %c0_15 = arith.constant 0 : index
    %c0_16 = arith.constant 0 : index
    %29 = vector.load %arg4[%c0_15, %c0_16] : memref<128x2xbf16, #tpu.memory_space<vmem>>, vector<128x2xbf16>
    %cst_17 = arith.constant dense<0.000000e+00> : vector<8x2xf32>
    %30 = tpu.matmul %28, %29, %cst_17 {dimension_numbers = #tpu.dot_dimension_numbers<[1], [0], [0], [1], [0, 0, 1, 1], [], []>} : vector<8x128xbf16>, vector<128x2xbf16>, vector<8x2xf32> -> vector<8x2xf32>
    %31 = vector.extract_strided_slice %0 {offsets = [3, 0], sizes = [1, 2], strides = [1, 1]} : vector<4x128xf32> to vector<1x2xf32>
    %32 = vector.broadcast %31 : vector<1x2xf32> to vector<8x2xf32>
    %33 = arith.addf %30, %32 : vector<8x2xf32>
    %34 = math.tanh %33 : vector<8x2xf32>
    %c0_18 = arith.constant 0 : index
    %c0_19 = arith.constant 0 : index
    %35 = vector.load %arg6[%c0_18, %c0_19] : memref<8x2xf32, #tpu.memory_space<vmem>>, vector<8x2xf32>
    tpu.vector_store %arg6[%c0_18, %c0_19], %34 {strides = array<i32>} : memref<8x2xf32, #tpu.memory_space<vmem>>, vector<8x2xf32>,
    return
  }
  func.func @transform_0(%arg0: i32) -> (i32, i32) {
    %c0_i32 = arith.constant 0 : i32
    %c0_i32_0 = arith.constant 0 : i32
    return %arg0, %c0_i32 : i32, i32
  }
  func.func @transform_1(%arg0: i32) -> (i32, i32) {
    %c0_i32 = arith.constant 0 : i32
    %c0_i32_0 = arith.constant 0 : i32
    %c0_i32_1 = arith.constant 0 : i32
    return %c0_i32, %c0_i32_0 : i32, i32
  }
  func.func @transform_2(%arg0: i32) -> (i32, i32, i32) {
    %c0_i32 = arith.constant 0 : i32
    %c0_i32_0 = arith.constant 0 : i32
    %c0_i32_1 = arith.constant 0 : i32
    %c0_i32_2 = arith.constant 0 : i32
    return %c0_i32, %c0_i32_0, %c0_i32_1 : i32, i32, i32
  }
  func.func @transform_3(%arg0: i32) -> (i32, i32) {
    %c0_i32 = arith.constant 0 : i32
    %c0_i32_0 = arith.constant 0 : i32
    %c0_i32_1 = arith.constant 0 : i32
    return %c0_i32, %c0_i32_0 : i32, i32
  }
  func.func @transform_4(%arg0: i32) -> (i32, i32) {
    %c0_i32 = arith.constant 0 : i32
    %c0_i32_0 = arith.constant 0 : i32
    %c0_i32_1 = arith.constant 0 : i32
    return %c0_i32, %c0_i32_0 : i32, i32
  }
  func.func @transform_5(%arg0: i32) -> (i32, i32) {
    %c0_i32 = arith.constant 0 : i32
    %c0_i32_0 = arith.constant 0 : i32
    return %arg0, %c0_i32 : i32, i32
  }
}

</mosaic_0001>

<bundles_post_ra>
// kernel: fully_connected_net.1
= control target key start
LH: loop header
LB: loop body
LE: loop exit
PB: predicated region body
PF: predicated region fallthrough
CT: control target
= control target key end

     0   :  { %v885_v0 = vmov 0   ;;  %vm230_vm0 = vcmask 64512   ;;  %vm234_vm1 = vcmask 1043456   ;;  %v886_v35 = vmov 0.0   ;;  %s1134_s1 = inlined_call_operand.vmem [shape: bf16[392,128], index: 1, kind: input, shape index: {}]   ;;  %s1135_s0 = inlined_call_operand.vmem [shape: f32[8,392], index: 0, kind: input, shape index: {}]   ;;  %s1136_s2 = inlined_call_operand.vmem [shape: bf16[2,128,128], index: 2, kind: input, shape index: {}]   ;;  %s1137_s4 = inlined_call_operand.vmem [shape: f32[4,128], index: 4, kind: input, shape index: {}]   ;;  %s1138_s3 = inlined_call_operand.vmem [shape: bf16[128,2], index: 3, kind: input, shape index: {}]   ;;  %s1139_s5 = inlined_call_operand.vmem [shape: f32[8,2], index: 5, kind: output, shape index: {}]  }
   0x1   :  { %278 = vmatprep.subr.bf16.mxu1 %v885_v0  ;;  %v834_v1 = vld [vmem:[%s1134_s1 + $0x40] sm:$0xff]   ;;  %v837_v4 = vld [vmem:[%s1134_s1 + $0x48] sm:$0xff]   ;;  %v840_v7 = vld [vmem:[%s1134_s1 + $0x50] sm:$0xff]   ;;  %vm887_vm2 = vmmov 0   ;;  %v79_v50 = vlaneseq  ;;  %vm650_vm3 = vcmask 15360  }
   0x2   :  { %v835_v2 = vld [vmem:[%s1134_s1 + $0x80] sm:$0xff]   ;;  %722 = vmatprep.subr.bf16.mxu0 %v834_v1  ;;  %v838_v5 = vld [vmem:[%s1134_s1 + $0x88] sm:$0xff]   ;;  %v841_v8 = vld [vmem:[%s1134_s1 + $0x90] sm:$0xff]  }
   0x3   :  { %v836_v3 = vld [vmem:[%s1134_s1] sm:$0xff]   ;;  %279 = vmatpush1.bf16.msra.mxu1 %v835_v2  ;;  %v839_v6 = vld [vmem:[%s1134_s1 + $0x8] sm:$0xff]   ;;  %v842_v9 = vld [vmem:[%s1134_s1 + $0x10] sm:$0xff]   ;;  %v1076_v51 = vshrl.u32 %v79_v50, 7 }
   0x4   :  { %723 = vmatpush3.bf16.msra.mxu0 %v836_v3  ;;  %280 = vmatprep.subr.bf16.mxu1 %v885_v0  ;;  %v843_v10 = vld [vmem:[%s1134_s1 + $0x58] sm:$0xff]   ;;  %v846_v13 = vld [vmem:[%s1134_s1 + $0x60] sm:$0xff]   ;;  %v849_v16 = vld [vmem:[%s1134_s1 + $0x68] sm:$0xff]  }
   0x5   :  { %724 = vmatprep.subr.bf16.mxu0 %v837_v4  ;;  %v844_v11 = vld [vmem:[%s1134_s1 + $0x98] sm:$0xff]   ;;  %v847_v14 = vld [vmem:[%s1134_s1 + $0xa0] sm:$0xff]   ;;  %v850_v17 = vld [vmem:[%s1134_s1 + $0xa8] sm:$0xff]   ;;  %v81_v52 = vsub.s32 0, %v1076_v51 }
   0x6   :  { %v845_v12 = vld [vmem:[%s1134_s1 + $0x18] sm:$0xff]   ;;  %v848_v15 = vld [vmem:[%s1134_s1 + $0x20] sm:$0xff]   ;;  %v851_v18 = vld [vmem:[%s1134_s1 + $0x28] sm:$0xff]  }
   0x7   :  { %281 = vmatpush1.bf16.msra.mxu1 %v838_v5  ;;  %v852_v19 = vld [vmem:[%s1134_s1 + $0x70] sm:$0xff]   ;;  %v23_v22 = vld [vmem:[%s1135_s0 + $0x8] sm:$0xff]  ;;  %v855_v23 = vld [vmem:[%s1134_s1 + $0x78] sm:$0xff]  }
   0x8   :  { %725 = vmatpush3.bf16.msra.mxu0 %v839_v6  ;;  %282 = vmatprep.subr.bf16.mxu1 %v885_v0  ;;  %v853_v20 = vld [vmem:[%s1134_s1 + $0xb0] sm:$0xff]   ;;  %v856_v24 = vld [vmem:[%s1134_s1 + $0xb8] sm:$0xff]   ;;  %v27_v25 = vpack.c.bf16 %v23_v22, %v23_v22  ;;  %v858_v27 = vld [vmem:[%s1134_s1 + $0xc0] ss:$0 sps:$4 sm:$0xff]  }
   0x9   :  { %726 = vmatprep.subr.bf16.mxu0 %v840_v7  ;;  %v854_v21 = vld [vmem:[%s1134_s1 + $0x30] sm:$0xff]   ;;  %v25_v26 = vld [vmem:[%s1135_s0 + $0x18] sm:$0xff]  ;;  %v22_v30 = vld [vmem:[%s1135_s0] sm:$0xff]  ;;  %v236_v32 = vsel %vm234_vm1, %v858_v27, 0 }
   0xa   :  { %v29_v28 = vpack.c.bf16 %v25_v26, %v25_v26  ;;  %v857_v29 = vld [vmem:[%s1134_s1 + $0x38] sm:$0xff]   ;;  %270 = vmatprep.mubr.bf16.mxu0 %v27_v25  ;;  %v24_v31 = vld [vmem:[%s1135_s0 + $0x10] sm:$0xff]  ;;  %v859_v33 = vld [vmem:[%s1136_s2] sm:$0xff]   ;;  %v26_v34 = vpack.c.bf16 %v22_v30, %v22_v30 }
   0xb   :  { %283 = vmatpush1.bf16.msra.mxu1 %v841_v8  ;;  %v28_v36 = vpack.c.bf16 %v24_v31, %v24_v31  ;;  %v860_v37 = vld [vmem:[%s1136_s2 + $0x8] sm:$0xff]   ;;  %v861_v38 = vld [vmem:[%s1136_s2 + $0x10] sm:$0xff]   ;;  %v862_v39 = vld [vmem:[%s1136_s2 + $0x18] sm:$0xff]  }
   0xc   :  { %727 = vmatpush3.bf16.msra.mxu0 %v842_v9  ;;  %284 = vmatprep.subr.bf16.mxu1 %v885_v0  ;;  %v863_v40 = vld [vmem:[%s1136_s2 + $0x20] sm:$0xff]   ;;  %v864_v41 = vld [vmem:[%s1136_s2 + $0x28] sm:$0xff]   ;;  %v865_v42 = vld [vmem:[%s1136_s2 + $0x30] sm:$0xff]  }
   0xd   :  { %728 = vmatprep.subr.bf16.mxu0 %v843_v10  ;;  %681 = vmatprep.mubr.msk.bf16.mxu1 %vm230_vm0, %v29_v28  ;;  %v866_v43 = vld [vmem:[%s1136_s2 + $0x38] sm:$0xff]   ;;  %v867_v44 = vld [vmem:[%s1136_s2 + $0x40] sm:$0xff]   ;;  %v868_v45 = vld [vmem:[%s1136_s2 + $0x48] sm:$0xff]  }
   0xe   :  { %v869_v46 = vld [vmem:[%s1136_s2 + $0x50] sm:$0xff]   ;;  %v870_v47 = vld [vmem:[%s1136_s2 + $0x58] sm:$0xff]   ;;  %v871_v48 = vld [vmem:[%s1136_s2 + $0x60] sm:$0xff]  }
   0xf   :  { %285 = vmatpush1.bf16.msra.mxu1 %v844_v11  ;;  %v872_v49 = vld [vmem:[%s1136_s2 + $0x68] sm:$0xff]   ;;  %v1082_v53 = vld [vmem:[%s1137_s4] sm:$0xf]  ;;  %v873_v4 = vld [vmem:[%s1136_s2 + $0x70] sm:$0xff]  }
  0x10   :  { %729 = vmatpush3.bf16.msra.mxu0 %v845_v12  ;;  %286 = vmatprep.subr.bf16.mxu1 %v885_v0  ;;  %v82_v55 = vrot.slane %v1082_v53, %v81_v52  ;;  %v874_v5 = vld [vmem:[%s1136_s2 + $0x78] sm:$0xff]   ;;  %v875_v6 = vld [vmem:[%s1138_s3] sm:$0xff]   ;;  %v876_v7 = vld [vmem:[%s1138_s3 + $0x8] sm:$0xff]   ;;  %v338_v12 = vsub.s32 1, %v1076_v51 }
  0x11   :  { %730 = vmatprep.subr.bf16.mxu0 %v846_v13  ;;  %v877_v8 = vld [vmem:[%s1138_s3 + $0x10] sm:$0xff]   ;;  %v878_v9 = vld [vmem:[%s1138_s3 + $0x18] sm:$0xff]   ;;  %v879_v10 = vld [vmem:[%s1138_s3 + $0x20] sm:$0xff]  }
  0x12   :  { %v880_v11 = vld [vmem:[%s1138_s3 + $0x28] sm:$0xff]   ;;  %v339_v13 = vrot.slane %v1082_v53, %v338_v12  ;;  %v882_v22 = vld [vmem:[%s1138_s3 + $0x38] sm:$0xff]  }
  0x13   :  { %287 = vmatpush1.bf16.msra.mxu1 %v847_v14 }
  0x14   :  { %731 = vmatpush3.bf16.msra.mxu0 %v848_v15  ;;  %288 = vmatprep.subr.bf16.mxu1 %v885_v0 }
  0x15   :  { %732 = vmatprep.subr.bf16.mxu0 %v849_v16 }
  0x17   :  { %289 = vmatpush1.bf16.msra.mxu1 %v850_v17 }
  0x18   :  { %733 = vmatpush3.bf16.msra.mxu0 %v851_v18  ;;  %290 = vmatprep.subr.bf16.mxu1 %v885_v0 }
  0x19   :  { %734 = vmatprep.subr.bf16.mxu0 %v852_v19 }
  0x1b   :  { %291 = vmatpush1.bf16.msra.mxu1 %v853_v20 }
  0x1c   :  { %735 = vmatpush3.bf16.msra.mxu0 %v854_v21  ;;  %292 = vmatprep.subr.bf16.mxu1 %v885_v0  ;;  %v881_v21 = vld [vmem:[%s1138_s3 + $0x30] sm:$0xff]  }
  0x1d   :  { %736 = vmatprep.subr.bf16.mxu0 %v855_v23  ;;  %v449_v23 = vsub.s32 2, %v1076_v51 }
  0x1f   :  { %293 = vmatpush1.bf16.msra.mxu1 %v856_v24  ;;  %v450_v24 = vrot.slane %v1082_v53, %v449_v23 }
  0x20   :  { %737 = vmatpush3.bf16.msra.mxu0 %v857_v29  ;;  %294 = vmatprep.subr.bf16.mxu1 %v885_v0 }
  0x21   :  { %771 = vmatprep.subr.bf16.mxu0 %v886_v35 }
  0x23   :  { %271 = vmatmul.mubr.bf16.vlgmr.msra.gmra.mrb[0].mxu0 %v26_v34  ;;  %295 = vmatpush1.bf16.msra.mxu1 %v236_v32  ;;  %v559_v32 = vsub.s32 3, %v1076_v51 }
  0x24   :  { %772 = vmatpush3.bf16.msra.mxu0 %v859_v33  ;;  %791 = vmatprep.subr.bf16.mxu1 %v886_v35 }
  0x25   :  { %773 = vmatprep.subr.bf16.mxu0 %v886_v35  ;;  %787 = vmatprep.mubr.msk.bf16.mxu0 %vm887_vm2, %v886_v35  ;;  %v560_v33 = vrot.slane %v1082_v53, %v559_v32 }
  0x26   :  { %311 = vmatmul.mubr.bf16.vlgmr.msra.gmra.mrb[0].mxu1 %v28_v36 }
  0x27   :  { %807 = vmatprep.mubr.msk.bf16.mxu1 %vm887_vm2, %v886_v35  ;;  %792 = vmatpush3.bf16.msra.mxu1 %v867_v44 }
  0x28   :  { %774 = vmatpush3.bf16.msra.mxu0 %v860_v37  ;;  %793 = vmatprep.subr.bf16.mxu1 %v886_v35 }
  0x29   :  { %775 = vmatprep.subr.bf16.mxu0 %v886_v35 }
  0x2b   :  { %794 = vmatpush3.bf16.msra.mxu1 %v868_v45 }
  0x2c   :  { %776 = vmatpush3.bf16.msra.mxu0 %v861_v38  ;;  %795 = vmatprep.subr.bf16.mxu1 %v886_v35 }
  0x2d   :  { %777 = vmatprep.subr.bf16.mxu0 %v886_v35 }
  0x2f   :  { %796 = vmatpush3.bf16.msra.mxu1 %v869_v46 }
  0x30   :  { %778 = vmatpush3.bf16.msra.mxu0 %v862_v39  ;;  %797 = vmatprep.subr.bf16.mxu1 %v886_v35 }
  0x31   :  { %779 = vmatprep.subr.bf16.mxu0 %v886_v35 }
  0x33   :  { %798 = vmatpush3.bf16.msra.mxu1 %v870_v47 }
  0x34   :  { %780 = vmatpush3.bf16.msra.mxu0 %v863_v40  ;;  %799 = vmatprep.subr.bf16.mxu1 %v886_v35 }
  0x35   :  { %781 = vmatprep.subr.bf16.mxu0 %v886_v35 }
  0x37   :  { %800 = vmatpush3.bf16.msra.mxu1 %v871_v48 }
  0x38   :  { %782 = vmatpush3.bf16.msra.mxu0 %v864_v41  ;;  %801 = vmatprep.subr.bf16.mxu1 %v886_v35 }
  0x39   :  { %783 = vmatprep.subr.bf16.mxu0 %v886_v35 }
  0x3b   :  { %802 = vmatpush3.bf16.msra.mxu1 %v872_v49 }
  0x3c   :  { %784 = vmatpush3.bf16.msra.mxu0 %v865_v42  ;;  %803 = vmatprep.subr.bf16.mxu1 %v886_v35 }
  0x3d   :  { %785 = vmatprep.subr.bf16.mxu0 %v886_v35 }
  0x3f   :  { %804 = vmatpush3.bf16.msra.mxu1 %v873_v4 }
  0x40   :  { %786 = vmatpush3.bf16.msra.mxu0 %v866_v43  ;;  %805 = vmatprep.subr.bf16.mxu1 %v886_v35 }
  0x41   :  { %811 = vmatprep.subr.bf16.mxu0 %v886_v35 }
  0x43   :  { %806 = vmatpush3.bf16.msra.mxu1 %v874_v5 }
  0xf6   :  { %v738_v54 = vpop.f32.mrb[0].mxu0 }
  0xf7   :  { %v739_v56 = vpop.f32.mrb[1].mxu0 }
  0xf8   :  { %v740_v57 = vadd.f32 %v739_v56, %v738_v54  ;;  %v741_v58 = vpop.f32.mrb[2].mxu0 }
  0xf9   :  { %v742_v59 = vpop.f32.mrb[3].mxu0  ;;  %v312_v60 = vpop.f32.mrb[0].mxu1 }
  0xfa   :  { %v273_v61 = vadd.f32 %v740_v57, %v82_v55  ;;  %v314_v62 = vpop.f32.mrb[1].mxu1 }
  0xfb   :  { %v315_v63 = vpop.f32.mrb[2].mxu1 }
  0xfc   :  { %v313_v0 = vadd.f32 %v312_v60, %v273_v61  ;;  %v316_v1 = vpop.f32.mrb[3].mxu1 }
  0xfe   :  { %v318_v2 = vmax.f32 %v313_v0, 0.0 }
 0x100   :  { %v319_v3 = vpack.c.bf16 %v318_v2, %v318_v2 }
 0x102   :  { %788 = vmatmul.mubr.bf16.vlgmr.msra.gmra.mrb[4].mxu0 %v319_v3 }
 0x103   :  { %827 = vmatprep.mubr.msk.bf16.mxu0 %vm887_vm2, %v886_v35  ;;  %812 = vmatpush3.bf16.msra.mxu0 %v875_v6 }
 0x104   :  { %813 = vmatprep.subr.bf16.mxu0 %v886_v35 }
 0x107   :  { %814 = vmatpush3.bf16.msra.mxu0 %v876_v7 }
 0x108   :  { %815 = vmatprep.subr.bf16.mxu0 %v886_v35 }
 0x10b   :  { %816 = vmatpush3.bf16.msra.mxu0 %v877_v8 }
 0x10c   :  { %817 = vmatprep.subr.bf16.mxu0 %v886_v35 }
 0x10f   :  { %818 = vmatpush3.bf16.msra.mxu0 %v878_v9 }
 0x110   :  { %819 = vmatprep.subr.bf16.mxu0 %v886_v35 }
 0x113   :  { %820 = vmatpush3.bf16.msra.mxu0 %v879_v10 }
 0x114   :  { %821 = vmatprep.subr.bf16.mxu0 %v886_v35 }
 0x117   :  { %822 = vmatpush3.bf16.msra.mxu0 %v880_v11 }
 0x118   :  { %823 = vmatprep.subr.bf16.mxu0 %v886_v35 }
 0x11b   :  { %824 = vmatpush3.bf16.msra.mxu0 %v881_v21 }
 0x11c   :  { %825 = vmatprep.subr.bf16.mxu0 %v886_v35 }
 0x11f   :  { %826 = vmatpush3.bf16.msra.mxu0 %v882_v22 }
 0x1d5   :  { %v422_v14 = vpop.f32.mrb[4].mxu0 }
 0x1d6   :  { %v423_v15 = vadd.f32 %v422_v14, %v339_v13  ;;  %v789_v16 = vpop.f32.mrb[5].mxu0 }
 0x1d7   :  { %v425_v17 = vpop.f32.mrb[6].mxu0 }
 0x1d8   :  { %v428_v18 = vmax.f32 %v423_v15, 0.0  ;;  %v790_v19 = vpop.f32.mrb[7].mxu0 }
 0x1da   :  { %v429_v20 = vpack.c.bf16 %v428_v18, %v428_v18 }
 0x1dc   :  { %808 = vmatmul.mubr.bf16.vlgmr.msra.gmra.mrb[4].mxu1 %v429_v20 }
 0x2af   :  { %v533_v25 = vpop.f32.mrb[4].mxu1 }
 0x2b0   :  { %v534_v26 = vadd.f32 %v533_v25, %v450_v24  ;;  %v809_v27 = vpop.f32.mrb[5].mxu1 }
 0x2b1   :  { %v536_v28 = vpop.f32.mrb[6].mxu1 }
 0x2b2   :  { %v539_v29 = vmax.f32 %v534_v26, 0.0  ;;  %v810_v30 = vpop.f32.mrb[7].mxu1 }
 0x2b4   :  { %v540_v31 = vpack.c.bf16 %v539_v29, %v539_v29 }
 0x2b6   :  { %828 = vmatmul.mubr.bf16.vlgmr.msra.gmra.mrb[8].mxu0 %v540_v31 }
 0x389   :  { %v643_v34 = vpop.f32.mrb[8].mxu0 }
 0x38a   :  { %v644_v35 = vadd.f32 %v643_v34, %v560_v33  ;;  %v829_v36 = vpop.f32.mrb[9].mxu0 }
 0x38b   :  { %v646_v37 = vpop.f32.mrb[10].mxu0 }
 0x38c   :  { %883 = vtanh.f32 %v644_v35  ;;  %v830_v38 = vpop.f32.mrb[11].mxu0 }
 0x396   :  { %v884_v39 = vpop.eup %883 }
 0x397   :  { %651 = vst.msk [vmem:[%s1139_s5] sm:$0xff] %vm650_vm3, %v884_v39 }

</bundles_post_ra>
